<compile_context>
chip_gen: v7x
topology: tpu7x:2x2x1
jax: 0.10.0
libtpu: 0.0.40
codegen_flags: <defaults>
</compile_context>

<pallas_src>
import jax
import jax.numpy as jnp
from jax import lax
from jax.experimental import pallas as pl
from jax.experimental.pallas import tpu as pltpu


def tokenizer_forward(x_nchw, w_oihw, *, stride=1, padding=1,
                      pool_k=3, pool_s=2, pool_p=1,
                      compute_dtype=jnp.float32):
    """Conv2d(bias=False) + MaxPool2d + flatten/transpose in one Pallas kernel."""
    assert stride == 1, "only conv stride=1 is supported"
    assert (pool_k, pool_s, pool_p) == (3, 2, 1), \
        "pooling decomposition assumes MaxPool2d(kernel=3, stride=2, padding=1)"

    N, CIN, H, W = x_nchw.shape
    COUT, CIN_w, K, K2 = w_oihw.shape
    assert CIN_w == CIN and K == K2

    HC = H + 2 * padding - K + 1          # conv output (stride 1)
    WC = W + 2 * padding - K + 1
    assert HC % 2 == 0 and WC % 2 == 0, "even conv-output extents assumed"
    HO, WO = HC // 2, WC // 2             # pooled output (k=3, s=2, p=1, floor)
    assert HO >= 1 and WO >= 1

    KKC = K * K * CIN                     # im2col contraction depth (27)
    KKCP = ((KKC + 7) // 8) * 8           # pad to a clean sublane multiple (32)

    # --- glue: layout only (NCHW->NHWC, spatial pad, im2col patch gather) ----
    xf = jnp.transpose(x_nchw, (0, 2, 3, 1)).astype(compute_dtype)
    xp = jnp.pad(xf, ((0, 0), (padding, padding), (padding, padding), (0, 0)))
    taps = [lax.slice(xp, (0, ky, kx, 0), (N, ky + HC, kx + WC, CIN))
            for ky in range(K) for kx in range(K)]
    patches = jnp.stack(taps, axis=3).reshape(N, HC * WC, KKC)     # (ky,kx,cin)
    patches = jnp.pad(patches, ((0, 0), (0, 0), (0, KKCP - KKC)))
    w2 = jnp.transpose(w_oihw, (2, 3, 1, 0)).reshape(KKC, COUT)    # (ky,kx,cin)xCOUT
    w2 = jnp.pad(w2.astype(compute_dtype), ((0, KKCP - KKC), (0, 0)))

    # --- kernel --------------------------------------------------------------
    def kernel(x_ref, w_ref, out_ref, hmax_ref):
        # x_ref:    (HC*WC, KKCP)  im2col patches for one image
        # w_ref:    (KKCP, COUT)
        # out_ref:  (HO*WO, COUT)
        # hmax_ref: VMEM (HO, WC + 1, COUT) scratch (W-pooling pass only)

        # Conv as a single MXU matmul.
        conv = jnp.dot(x_ref[...], w_ref[...],
                       preferred_element_type=jnp.float32)          # (HC*WC, COUT)

        # H-direction max pool (window 3, stride 2, pad 1) on values only.
        # Split conv rows into even/odd along a LEADING dim (free reshape).
        conv4 = conv.reshape(HO, 2, WC, COUT)
        even = conv4[:, 0]                      # rows 2*ho       (HO, WC, COUT)
        odd = conv4[:, 1]                       # rows 2*ho + 1
        eo = jnp.maximum(even, odd)
        # hmax[ho] = max(conv[2ho-1], conv[2ho], conv[2ho+1]); row -1 is -inf.
        # Write hmax into the scratch with a single -inf column on the left so
        # the W-direction window can use strided ref reads.
        hmax_ref[:, pl.ds(0, 1), :] = jnp.full((HO, 1, COUT), -jnp.inf,
                                               jnp.float32)
        hmax_ref[pl.ds(0, 1), pl.ds(1, WC), :] = eo[0:1]
        if HO > 1:
            hmax_ref[pl.ds(1, HO - 1), pl.ds(1, WC), :] = jnp.maximum(
                eo[1:], odd[:HO - 1])

        # W-direction max pool: out[:, wo] = max_dx hmax_pad[:, 2*wo + dx].
        pooled = hmax_ref[:, pl.ds(0, WO, stride=2), :]
        for dx in range(1, 3):
            pooled = jnp.maximum(pooled, hmax_ref[:, pl.ds(dx, WO, stride=2), :])

        # flatten(H, W) then "transpose": channel-last already gives (seq, C).
        out_ref[...] = pooled.reshape(HO * WO, COUT)

    out = pl.pallas_call(
        kernel,
        out_shape=jax.ShapeDtypeStruct((N, HO * WO, COUT), jnp.float32),
        grid=(N,),
        in_specs=[
            pl.BlockSpec((None, HC * WC, KKCP), lambda b: (b, 0, 0)),
            pl.BlockSpec((KKCP, COUT), lambda b: (0, 0)),
        ],
        out_specs=pl.BlockSpec((None, HO * WO, COUT), lambda b: (b, 0, 0)),
        scratch_shapes=[pltpu.VMEM((HO, WC + 1, COUT), jnp.float32)],
        compiler_params=pltpu.CompilerParams(
            dimension_semantics=("parallel",),
            vmem_limit_bytes=32 * 1024 * 1024),
    )(patches, w2)
    return out


def tokenizer_reference(x_nchw, w_oihw):
    """Pure-JAX reference matching the PyTorch module."""
    conv = lax.conv_general_dilated(
        x_nchw, w_oihw, window_strides=(1, 1), padding=((1, 1), (1, 1)),
        dimension_numbers=("NCHW", "OIHW", "NCHW"))
    pooled = lax.reduce_window(
        conv, -jnp.inf, lax.max,
        window_dimensions=(1, 1, 3, 3), window_strides=(1, 1, 2, 2),
        padding=((0, 0), (0, 0), (1, 1), (1, 1)))
    n, c, ho, wo = pooled.shape
    return jnp.transpose(pooled.reshape(n, c, ho * wo), (0, 2, 1))


if __name__ == "__main__":
    key = jax.random.PRNGKey(0)
    kx, kw = jax.random.split(key)

    # Module defaults: n_conv_layers=1, n_input_channels=3, n_output_channels=64,
    # kernel=3, stride=1, padding=1, max-pool 3/2/1.
    N, CIN, H, W = 2, 3, 16, 16
    COUT, K = 64, 3

    x = jax.random.normal(kx, (N, CIN, H, W), dtype=jnp.float32)
    # Kaiming-normal init of the conv weight (fan_in mode, gain sqrt(2)).
    fan_in = CIN * K * K
    w = jax.random.normal(kw, (COUT, CIN, K, K), dtype=jnp.float32) * jnp.sqrt(
        2.0 / fan_in)

    out = tokenizer_forward(x, w)
    out = jax.block_until_ready(out)

    ref = tokenizer_reference(x, w)
    assert out.shape == (N, (H // 2) * (W // 2), COUT), out.shape
    max_err = float(jnp.max(jnp.abs(out - ref)))
    assert max_err < 1e-3, f"max abs err {max_err}"

    print("KERNEL_OK")
</pallas_src>

<mosaic_0001>
module attributes {stable_mosaic.version = 11 : i64} {
  func.func @kernel(%arg0: i32, %arg1: memref<1x256x32xf32, #tpu.memory_space<vmem>>, %arg2: memref<32x64xf32, #tpu.memory_space<vmem>>, %arg3: memref<1x64x64xf32, #tpu.memory_space<vmem>>, %arg4: memref<8x17x64xf32, #tpu.memory_space<vmem>>) attributes {dimension_semantics = [#tpu.dimension_semantics<parallel>], iteration_bounds = array<i64: 2>, scalar_prefetch = 0 : i64, scratch_operands = 1 : i64, tpu.core_type = #tpu.core_type<tc>, window_params = [{transform_indices = @transform_0, window_bounds = array<i64: 1, 256, 32>}, {pipeline_mode = #tpu.pipeline_mode<synchronous>, transform_indices = @transform_1, window_bounds = array<i64: 32, 64>}, {transform_indices = @transform_2, window_bounds = array<i64: 1, 64, 64>}]} {
    %c0 = arith.constant 0 : index
    %c0_0 = arith.constant 0 : index
    %c0_1 = arith.constant 0 : index
    %0 = vector.load %arg1[%c0, %c0_0, %c0_1] : memref<1x256x32xf32, #tpu.memory_space<vmem>>, vector<1x256x32xf32>
    %1 = vector.shape_cast %0 : vector<1x256x32xf32> to vector<256x32xf32>
    %c0_2 = arith.constant 0 : index
    %c0_3 = arith.constant 0 : index
    %2 = vector.load %arg2[%c0_2, %c0_3] : memref<32x64xf32, #tpu.memory_space<vmem>>, vector<32x64xf32>
    %cst = arith.constant dense<0.000000e+00> : vector<256x64xf32>
    %3 = tpu.matmul %1, %2, %cst {dimension_numbers = #tpu.dot_dimension_numbers<[1], [0], [0], [1], [0, 0, 1, 1], [], []>} : vector<256x32xf32>, vector<32x64xf32>, vector<256x64xf32> -> vector<256x64xf32>
    %4 = vector.shape_cast %3 : vector<256x64xf32> to vector<8x2x16x64xf32>
    %5 = vector.extract_strided_slice %4 {offsets = [0, 0, 0, 0], sizes = [8, 1, 16, 64], strides = [1, 1, 1, 1]} : vector<8x2x16x64xf32> to vector<8x1x16x64xf32>
    %6 = vector.shape_cast %5 : vector<8x1x16x64xf32> to vector<8x16x64xf32>
    %7 = vector.extract_strided_slice %4 {offsets = [0, 1, 0, 0], sizes = [8, 1, 16, 64], strides = [1, 1, 1, 1]} : vector<8x2x16x64xf32> to vector<8x1x16x64xf32>
    %8 = vector.shape_cast %7 : vector<8x1x16x64xf32> to vector<8x16x64xf32>
    %9 = arith.maximumf %6, %8 : vector<8x16x64xf32>
    %cst_4 = arith.constant 0xFF800000 : f32
    %10 = vector.broadcast %cst_4 : f32 to vector<8x1x64xf32>
    %c0_5 = arith.constant 0 : index
    %c0_6 = arith.constant 0 : index
    %c0_7 = arith.constant 0 : index
    %11 = vector.load %arg4[%c0_5, %c0_6, %c0_7] : memref<8x17x64xf32, #tpu.memory_space<vmem>>, vector<8x1x64xf32>
    tpu.vector_store %arg4[%c0_5, %c0_6, %c0_7], %10 {strides = array<i32>} : memref<8x17x64xf32, #tpu.memory_space<vmem>>, vector<8x1x64xf32>,
    %12 = vector.extract_strided_slice %9 {offsets = [0, 0, 0], sizes = [1, 16, 64], strides = [1, 1, 1]} : vector<8x16x64xf32> to vector<1x16x64xf32>
    %c0_8 = arith.constant 0 : index
    %c1 = arith.constant 1 : index
    %c0_9 = arith.constant 0 : index
    %13 = vector.load %arg4[%c0_8, %c1, %c0_9] : memref<8x17x64xf32, #tpu.memory_space<vmem>>, vector<1x16x64xf32>
    tpu.vector_store %arg4[%c0_8, %c1, %c0_9], %12 {strides = array<i32>} : memref<8x17x64xf32, #tpu.memory_space<vmem>>, vector<1x16x64xf32>,
    %14 = vector.extract_strided_slice %9 {offsets = [1, 0, 0], sizes = [7, 16, 64], strides = [1, 1, 1]} : vector<8x16x64xf32> to vector<7x16x64xf32>
    %15 = vector.extract_strided_slice %8 {offsets = [0, 0, 0], sizes = [7, 16, 64], strides = [1, 1, 1]} : vector<8x16x64xf32> to vector<7x16x64xf32>
    %16 = arith.maximumf %14, %15 : vector<7x16x64xf32>
    %c1_10 = arith.constant 1 : index
    %c1_11 = arith.constant 1 : index
    %c0_12 = arith.constant 0 : index
    %17 = vector.load %arg4[%c1_10, %c1_11, %c0_12] : memref<8x17x64xf32, #tpu.memory_space<vmem>>, vector<7x16x64xf32>
    tpu.vector_store %arg4[%c1_10, %c1_11, %c0_12], %16 {strides = array<i32>} : memref<8x17x64xf32, #tpu.memory_space<vmem>>, vector<7x16x64xf32>,
    %c0_13 = arith.constant 0 : index
    %c0_14 = arith.constant 0 : index
    %c0_15 = arith.constant 0 : index
    %18 = tpu.strided_load %arg4[%c0_13, %c0_14, %c0_15] {strides = array<i32: 1, 2, 1>} : memref<8x17x64xf32, #tpu.memory_space<vmem>>, vector<8x8x64xf32>
    %c0_16 = arith.constant 0 : index
    %c1_17 = arith.constant 1 : index
    %c0_18 = arith.constant 0 : index
    %19 = tpu.strided_load %arg4[%c0_16, %c1_17, %c0_18] {strides = array<i32: 1, 2, 1>} : memref<8x17x64xf32, #tpu.memory_space<vmem>>, vector<8x8x64xf32>
    %20 = arith.maximumf %18, %19 : vector<8x8x64xf32>
    %c0_19 = arith.constant 0 : index
    %c2 = arith.constant 2 : index
    %c0_20 = arith.constant 0 : index
    %21 = tpu.strided_load %arg4[%c0_19, %c2, %c0_20] {strides = array<i32: 1, 2, 1>} : memref<8x17x64xf32, #tpu.memory_space<vmem>>, vector<8x8x64xf32>
    %22 = arith.maximumf %20, %21 : vector<8x8x64xf32>
    %23 = vector.shape_cast %22 : vector<8x8x64xf32> to vector<64x64xf32>
    %c0_21 = arith.constant 0 : index
    %c0_22 = arith.constant 0 : index
    %c0_23 = arith.constant 0 : index
    %24 = vector.load %arg3[%c0_21, %c0_22, %c0_23] : memref<1x64x64xf32, #tpu.memory_space<vmem>>, vector<1x64x64xf32>
    %25 = vector.shape_cast %24 : vector<1x64x64xf32> to vector<64x64xf32>
    %26 = vector.shape_cast %23 : vector<64x64xf32> to vector<1x64x64xf32>
    tpu.vector_store %arg3[%c0_21, %c0_22, %c0_23], %26 {strides = array<i32>} : memref<1x64x64xf32, #tpu.memory_space<vmem>>, vector<1x64x64xf32>,
    return
  }
  func.func @transform_0(%arg0: i32) -> (i32, i32, i32) {
    %c0_i32 = arith.constant 0 : i32
    %c0_i32_0 = arith.constant 0 : i32
    %c0_i32_1 = arith.constant 0 : i32
    return %arg0, %c0_i32, %c0_i32_0 : i32, i32, i32
  }
  func.func @transform_1(%arg0: i32) -> (i32, i32) {
    %c0_i32 = arith.constant 0 : i32
    %c0_i32_0 = arith.constant 0 : i32
    %c0_i32_1 = arith.constant 0 : i32
    return %c0_i32, %c0_i32_0 : i32, i32
  }
  func.func @transform_2(%arg0: i32) -> (i32, i32, i32) {
    %c0_i32 = arith.constant 0 : i32
    %c0_i32_0 = arith.constant 0 : i32
    %c0_i32_1 = arith.constant 0 : i32
    return %arg0, %c0_i32, %c0_i32_0 : i32, i32, i32
  }
}

</mosaic_0001>

<bundles_post_ra>
// kernel: tpu_custom_call.1
= control target key start
LH: loop header
LB: loop body
LE: loop exit
PB: predicated region body
PF: predicated region fallthrough
CT: control target
= control target key end

     0   :  { %7 = vsyncpa [#allocation4], 0  ;;  %s1219_s0 = inlined_call_operand.vmem [shape: f32[2,256,32], index: 0, kind: input, shape index: {}]   ;;  %s1220_s1 = inlined_call_operand.vmem [shape: f32[32,64], index: 1, kind: input, shape index: {}]   ;;  %s1221_s2 = inlined_call_operand.hbm [shape: f32[2,64,64], index: 2, kind: output, shape index: {}]  }
   0x1   :  { %9 = vsyncpa [#allocation4 + $0x1], 0  ;;  %s979_s9 = smov 0   ;;  %s981_s10 = smov 0  }
   0x2   :  { %s983_s11 = smov 0   ;;  %s985_s12 = smov 0  }
   0x3 LB: > { %s1000_s13 = sadd.s32 4294967295, %s958_s12   ;;  %s704_s14 = sadd.s32 4294967294, %s958_s12   ;;  %s958_s12 = sphi %s985_s12, %s1227_s12   ;;  %s954_s11 = sphi %s983_s11, %s1226_s11   ;;  %s950_s10 = sphi %s981_s10, %s1225_s10   ;;  %s946_s9 = sphi %s979_s9, %s1224_s9  }
   0x4   : > { %s1004_s15 = sadd.s32 1, %s958_s12   ;;  %s69_s16 = sadd.s32 1, %s954_s11 }
   0x5   : > { %s66_s17 = ssub.s32 %s958_s12, %s1004_s15  ;;  %p79_p0 = scmp.ne.s32.totalorder %s954_s11, %s950_s10 }
   0x6   : > { %p67_p1 = scmp.eq.s32.totalorder %s66_s17, 0  ;;  %p80_p2 = scmp.eq.s32.totalorder %s1000_s13, 1 }
   0x7   : > { %p85_p3 = scmp.ne.s32.totalorder %s950_s10, %s946_s9  ;;  %p86_p4 = scmp.eq.s32.totalorder %s704_s14, 1 }
   0x8   : > { %s1015_s18 = scalar_select %p67_p1, %s954_s11, %s69_s16  }
   0x9   : > { %p1017_p5 = por %p80_p2, %p79_p0  ;;  %p1021_p6 = por %p86_p4, %p85_p3 }
   0xa   : > { %p707_p7 = scmp.ge.s32.totalorder %s958_s12, 1  ;;  %p115_p8 = scmp.lt.s32.totalorder %s958_s12, 3 }
   0xc   : > { %p116_p9 = pnand %p707_p7, %p115_p8 }
   0xd   : > { %v174_v0 = vld [vmem:[%s1220_s1] sm:$0xff] (!%p116_p9)  ;;  %v175_v1 = vld [vmem:[%s1220_s1 + $0x8] sm:$0xff] (!%p116_p9)  ;;  %v176_v2 = vld [vmem:[%s1220_s1 + $0x10] sm:$0xff] (!%p116_p9)  ;;  %p137_p10 = scmp.lt.s32.totalorder (!%p116_p9), %s1000_s13, 1  ;;  %vm178_vm0 = vcmask (!%p116_p9), 261120   ;;  %vm516_vm1 = vcmask (!%p116_p9), 516096  }
   0xe   : > { %119 = sbr.rel (%p116_p9) target bundleno = 300 (0x12c), region = 28  ;;  %v842_v3 = vpack.c.bf16 (!%p116_p9), %v175_v1, %v174_v0  ;;  %v177_v4 = vld [vmem:[%s1220_s1 + $0x18] sm:$0xff] (!%p116_p9)  ;;  %v960_v38 = vmov (!%p116_p9), -inf   ;;  %vm525_vm2 = vcmask (!%p116_p9), 523264   ;;  %s134_s6 = sand.u32 (!%p116_p9), 1, %s950_s10  }
   0xf   : > { %v846_v5 = vpack.c.bf16 (!%p116_p9), %v177_v4, %v176_v2  ;;  %517 = vst.msk [vmem:[#allocation2] sm:$0x1] (!%p116_p9), %vm516_vm1, %v960_v38  ;;  %518 = vst.msk [vmem:[#allocation2 + $0x18] sm:$0x1] (!%p116_p9), %vm516_vm1, %v960_v38  ;;  %s708_s7 = sshll.u32 (!%p116_p9), %s134_s6, 6  ;;  %s749_s14 = sshll.u32 (!%p116_p9), %s1000_s13, 10 }
  0x10   : > { %843 = vmatprep.subr.bf16.mxu0 (!%p116_p9), %v842_v3  ;;  %850 = vmatprep.subr.bf16.mxu1 (!%p116_p9), %v842_v3  ;;  %519 = vst.msk [vmem:[#allocation2 + $0x30] sm:$0x1] (!%p116_p9), %vm516_vm1, %v960_v38  ;;  %520 = vst.msk [vmem:[#allocation2 + $0x48] sm:$0x1] (!%p116_p9), %vm516_vm1, %v960_v38  ;;  %s1133_s8 = scalar_lea.vmem (!%p116_p9), [#allocation3], %s708_s7  ;;  %s1168_s21 = scalar_lea.hbm (!%p116_p9), %s1221_s2, %s749_s14 }
  0x11   : > { %845 = vmatpush3.bf16.msra.mxu0 (!%p116_p9), %v842_v3  ;;  %852 = vmatpush3.bf16.msra.mxu1 (!%p116_p9), %v842_v3  ;;  %521 = vst.msk [vmem:[#allocation2 + $0x60] sm:$0x1] (!%p116_p9), %vm516_vm1, %v960_v38  ;;  %522 = vst.msk [vmem:[#allocation2 + $0x78] sm:$0x1] (!%p116_p9), %vm516_vm1, %v960_v38  ;;  %s642_s16 = sshll.u32 (!%p116_p9), %s1133_s8, 4  ;;  %s1178_s22 = scalar_lea.sflag (!%p116_p9), [#allocation4], %s134_s6  ;;  %s1170_s16 = int_to_ptr.vmem [resolvable:$true] %s642_s16 }
  0x12   : > { %847 = vmatprep.subr.bf16.mxu0 (!%p116_p9), %v846_v5  ;;  %851 = vmatprep.subr.bf16.mxu1 (!%p116_p9), %v846_v5  ;;  %523 = vst.msk [vmem:[#allocation2 + $0x90] sm:$0x1] (!%p116_p9), %vm516_vm1, %v960_v38  ;;  %524 = vst.msk [vmem:[#allocation2 + $0xa8] sm:$0x1] (!%p116_p9), %vm516_vm1, %v960_v38  ;;  %s896_s23 = scalar_lea.vmem (!%p116_p9), %s1170_s16, 1024  ;;  %s961_s24 = smov (!%p116_p9), [#allocation3]  }
  0x13   : > { %p897_p11 = scmp.ne.s32.totalorder (!%p116_p9), %s1170_s16, %s896_s23  ;;  %s900_s25 = sshll.u32 (!%p116_p9), %s961_s24, 4  ;;  %s901_s25 = int_to_ptr.vmem [resolvable:$false] %s900_s25 }
  0x14   : > { %s902_s26 = scalar_lea.vmem (!%p116_p9), %s901_s25, 2048  ;;  %p903_p0 = scmp.lt.s32.totalorder (!%p116_p9), %s1170_s16, %s901_s25 }
  0x15   : > { %s138_s29 = scalar_select %p137_p10, %s1000_s13, 1  ;;  %849 = vmatpush3.bf16.msra.mxu0 %v846_v5  ;;  %853 = vmatpush3.bf16.msra.mxu1 %v846_v5 }
  0x16   : > { %p898_p12 = pnand %p897_p11, %p1017_p5  ;;  %p904_p1 = scmp.lt.s32.totalorder %s902_s26, %s896_s23 }
  0x17   : > { %s748_s30 = sshll.u32 %s138_s29, 8 }
  0x18   : > { %s1044_s5 = scalar_lea.vmem %s1219_s0, %s748_s30  ;;  %p899_p13 = pneg %p898_p12 }
  0x19   : > { %v142_v6 = vld [vmem:[%s1044_s5] sm:$0xff]  ;;  %v143_v8 = vld [vmem:[%s1044_s5 + $0x8] sm:$0xff]  ;;  %v144_v10 = vld [vmem:[%s1044_s5 + $0x10] sm:$0xff]  ;;  %p905_p2 = por %p904_p1, %p903_p0 }
  0x1a   : > { %v158_v7 = vld [vmem:[%s1044_s5 + $0x80] sm:$0xff]  ;;  %794 = vmatprep.mubr.msk.f32.mxu0 %vm178_vm0, %v142_v6  ;;  %v159_v9 = vld [vmem:[%s1044_s5 + $0x88] sm:$0xff]  ;;  %v160_v11 = vld [vmem:[%s1044_s5 + $0x90] sm:$0xff] }
  0x1b   : > { %818 = vmatprep.mubr.msk.f32.mxu1 %vm178_vm0, %v158_v7  ;;  %795 = vmatmul.mubr.msk.f32.vlgmr.msra.gmra.mrb[0].mxu0 %vm178_vm0, %v143_v8  ;;  %v145_v12 = vld [vmem:[%s1044_s5 + $0x18] sm:$0xff]  ;;  %v146_v14 = vld [vmem:[%s1044_s5 + $0x20] sm:$0xff]  ;;  %v147_v16 = vld [vmem:[%s1044_s5 + $0x28] sm:$0xff]  ;;  %p906_p3 = pnand %p905_p2, %p899_p13 }
  0x1c   : > { %819 = vmatmul.mubr.msk.f32.vlgmr.msra.gmra.mrb[0].mxu1 %vm178_vm0, %v159_v9  ;;  %797 = vmatprep.mubr.msk.f32.mxu0 %vm178_vm0, %v144_v10  ;;  %v161_v13 = vld [vmem:[%s1044_s5 + $0x98] sm:$0xff]  ;;  %v162_v15 = vld [vmem:[%s1044_s5 + $0xa0] sm:$0xff]  ;;  %v163_v17 = vld [vmem:[%s1044_s5 + $0xa8] sm:$0xff] }
  0x1d   : > { %821 = vmatprep.mubr.msk.f32.mxu1 %vm178_vm0, %v160_v11  ;;  %v148_v18 = vld [vmem:[%s1044_s5 + $0x30] sm:$0xff]  ;;  %v149_v20 = vld [vmem:[%s1044_s5 + $0x38] sm:$0xff]  ;;  %v150_v22 = vld [vmem:[%s1044_s5 + $0x40] sm:$0xff] }
  0x1e   : > { %v164_v19 = vld [vmem:[%s1044_s5 + $0xb0] sm:$0xff]  ;;  %v165_v21 = vld [vmem:[%s1044_s5 + $0xb8] sm:$0xff]  ;;  %v166_v23 = vld [vmem:[%s1044_s5 + $0xc0] sm:$0xff] }
  0x1f   : > { %798 = vmatmul.mubr.msk.f32.gmra.mrb[2].mxu0 %vm178_vm0, %v145_v12  ;;  %v151_v24 = vld [vmem:[%s1044_s5 + $0x48] sm:$0xff]  ;;  %v152_v26 = vld [vmem:[%s1044_s5 + $0x50] sm:$0xff]  ;;  %v153_v28 = vld [vmem:[%s1044_s5 + $0x58] sm:$0xff] }
  0x20   : > { %822 = vmatmul.mubr.msk.f32.gmra.mrb[2].mxu1 %vm178_vm0, %v161_v13  ;;  %800 = vmatprep.mubr.msk.f32.mxu0 %vm178_vm0, %v146_v14  ;;  %v167_v25 = vld [vmem:[%s1044_s5 + $0xc8] sm:$0xff]  ;;  %v168_v27 = vld [vmem:[%s1044_s5 + $0xd0] sm:$0xff]  ;;  %v169_v29 = vld [vmem:[%s1044_s5 + $0xd8] sm:$0xff] }
  0x21   : > { %824 = vmatprep.mubr.msk.f32.mxu1 %vm178_vm0, %v162_v15  ;;  %v154_v30 = vld [vmem:[%s1044_s5 + $0x60] sm:$0xff]  ;;  %v155_v32 = vld [vmem:[%s1044_s5 + $0x68] sm:$0xff]  ;;  %v156_v34 = vld [vmem:[%s1044_s5 + $0x70] sm:$0xff] }
  0x22   : > { %v170_v31 = vld [vmem:[%s1044_s5 + $0xe0] sm:$0xff]  ;;  %v171_v33 = vld [vmem:[%s1044_s5 + $0xe8] sm:$0xff]  ;;  %v172_v35 = vld [vmem:[%s1044_s5 + $0xf0] sm:$0xff] }
  0x23   : > { %801 = vmatmul.mubr.msk.f32.gmra.mrb[4].mxu0 %vm178_vm0, %v147_v16  ;;  %v157_v36 = vld [vmem:[%s1044_s5 + $0x78] sm:$0xff] }
  0x24   : > { %825 = vmatmul.mubr.msk.f32.gmra.mrb[4].mxu1 %vm178_vm0, %v163_v17  ;;  %803 = vmatprep.mubr.msk.f32.mxu0 %vm178_vm0, %v148_v18  ;;  %v173_v37 = vld [vmem:[%s1044_s5 + $0xf8] sm:$0xff] }
  0x25   : > { %827 = vmatprep.mubr.msk.f32.mxu1 %vm178_vm0, %v164_v19 }
  0x27   : > { %804 = vmatmul.mubr.msk.f32.gmra.mrb[6].mxu0 %vm178_vm0, %v149_v20 }
  0x28   : > { %828 = vmatmul.mubr.msk.f32.gmra.mrb[6].mxu1 %vm178_vm0, %v165_v21  ;;  %806 = vmatprep.mubr.msk.f32.mxu0 %vm178_vm0, %v150_v22 }
  0x29   : > { %830 = vmatprep.mubr.msk.f32.mxu1 %vm178_vm0, %v166_v23 }
  0x2b   : > { %807 = vmatmul.mubr.msk.f32.gmra.mrb[8].mxu0 %vm178_vm0, %v151_v24 }
  0x2c   : > { %831 = vmatmul.mubr.msk.f32.gmra.mrb[8].mxu1 %vm178_vm0, %v167_v25  ;;  %809 = vmatprep.mubr.msk.f32.mxu0 %vm178_vm0, %v152_v26 }
  0x2d   : > { %833 = vmatprep.mubr.msk.f32.mxu1 %vm178_vm0, %v168_v27 }
  0x2f   : > { %810 = vmatmul.mubr.msk.f32.gmra.mrb[10].mxu0 %vm178_vm0, %v153_v28 }
  0x30   : > { %834 = vmatmul.mubr.msk.f32.gmra.mrb[10].mxu1 %vm178_vm0, %v169_v29  ;;  %812 = vmatprep.mubr.msk.f32.mxu0 %vm178_vm0, %v154_v30 }
  0x31   : > { %836 = vmatprep.mubr.msk.f32.mxu1 %vm178_vm0, %v170_v31 }
  0x33   : > { %813 = vmatmul.mubr.msk.f32.gmra.mrb[12].mxu0 %vm178_vm0, %v155_v32 }
  0x34   : > { %837 = vmatmul.mubr.msk.f32.gmra.mrb[12].mxu1 %vm178_vm0, %v171_v33  ;;  %815 = vmatprep.mubr.msk.f32.mxu0 %vm178_vm0, %v156_v34 }
  0x35   : > { %839 = vmatprep.mubr.msk.f32.mxu1 %vm178_vm0, %v172_v35 }
  0x37   : > { %816 = vmatmul.mubr.msk.f32.gmra.mrb[14].mxu0 %vm178_vm0, %v157_v36 }
  0x38   : > { %840 = vmatmul.mubr.msk.f32.gmra.mrb[14].mxu1 %vm178_vm0, %v173_v37 }
  0xee   : > { %v796_v39 = vpop.f32.mrb[0].mxu0 }
  0xef   : > { %v1110_v40 = vpop.f32.mrb[0].mxu1  ;;  %v341_v41 = vpop.f32.mrb[1].mxu0 }
  0xf0   : > { %v1112_v42 = vpop.f32.mrb[1].mxu1 }
  0xf2   : > { %v799_v43 = vpop.f32.mrb[2].mxu0 }
  0xf3   : > { %v1114_v44 = vpop.f32.mrb[2].mxu1  ;;  %v501_v45 = vmax.f32 %v796_v39, %v799_v43  ;;  %v351_v47 = vpop.f32.mrb[3].mxu0 }
  0xf4   : > { %v509_v46 = vmax.f32 %v1110_v40, %v1114_v44  ;;  %v1118_v48 = vpop.f32.mrb[3].mxu1  ;;  %v500_v49 = vmax.f32 %v341_v41, %v351_v47 }
  0xf5   : > { %v508_v50 = vmax.f32 %v1112_v42, %v1118_v48  ;;  %527 = vst.msk [vmem:[#allocation2 + $0x9] sm:$0xff] %vm525_vm2, %v501_v45 }
  0xf6   : > { %526 = vst.msk [vmem:[#allocation2 + $0x1] sm:$0xff] %vm525_vm2, %v500_v49  ;;  %v802_v51 = vpop.f32.mrb[4].mxu0 }
  0xf7   : > { %v826_v52 = vpop.f32.mrb[4].mxu1  ;;  %v361_v53 = vpop.f32.mrb[5].mxu0 }
  0xf8   : > { %v441_v54 = vpop.f32.mrb[5].mxu1 }
  0xfa   : > { %v805_v55 = vpop.f32.mrb[6].mxu0 }
  0xfb   : > { %v829_v56 = vpop.f32.mrb[6].mxu1  ;;  %v503_v57 = vmax.f32 %v802_v51, %v805_v55  ;;  %v371_v59 = vpop.f32.mrb[7].mxu0 }
  0xfc   : > { %v511_v58 = vmax.f32 %v826_v52, %v829_v56  ;;  %v451_v60 = vpop.f32.mrb[7].mxu1  ;;  %v502_v61 = vmax.f32 %v361_v53, %v371_v59 }
  0xfd   : > { %v510_v62 = vmax.f32 %v441_v54, %v451_v60  ;;  %v557_v63 = vld [vmem:[#allocation2] ss:$2 sm:$0xff]  ;;  %v573_v0 = vld [vmem:[#allocation2 + $0x1] ss:$2 sm:$0xff]  ;;  %v529_v1 = vmax.f32 %v503_v57, %v799_v43 }
  0xfe   : > { %v537_v2 = vmax.f32 %v511_v58, %v1114_v44  ;;  %v588_v3 = vmax.f32 %v557_v63, %v573_v0  ;;  %v528_v4 = vmax.f32 %v502_v61, %v351_v47  ;;  %v808_v6 = vpop.f32.mrb[8].mxu0  ;;  %v597_v8 = vld [vmem:[#allocation2 + $0x2] ss:$2 sm:$0xff] }
  0xff   : > { %v536_v5 = vmax.f32 %v510_v62, %v1118_v48  ;;  %v832_v7 = vpop.f32.mrb[8].mxu1  ;;  %544 = vst.msk [vmem:[#allocation2 + $0x21] sm:$0xff] %vm525_vm2, %v529_v1  ;;  %v381_v9 = vpop.f32.mrb[9].mxu0 }
 0x100   : > { %552 = vst.msk [vmem:[#allocation2 + $0x81] sm:$0xff] %vm525_vm2, %v537_v2  ;;  %v461_v10 = vpop.f32.mrb[9].mxu1  ;;  %v612_v11 = vmax.f32 %v588_v3, %v597_v8  ;;  %543 = vst.msk [vmem:[#allocation2 + $0x19] sm:$0xff] %vm525_vm2, %v528_v4 }
 0x101   : > { %551 = vst.msk [vmem:[#allocation2 + $0x79] sm:$0xff] %vm525_vm2, %v536_v5 }
 0x102   : > { %620 = vst.msk [vmem:[%s1133_s8] sm:$0xff] %vm525_vm2, %v612_v11  ;;  %v811_v12 = vpop.f32.mrb[10].mxu0 }
 0x103   : > { %v835_v13 = vpop.f32.mrb[10].mxu1  ;;  %v505_v14 = vmax.f32 %v808_v6, %v811_v12  ;;  %v391_v16 = vpop.f32.mrb[11].mxu0 }
 0x104   : > { %v513_v15 = vmax.f32 %v832_v7, %v835_v13  ;;  %v471_v17 = vpop.f32.mrb[11].mxu1  ;;  %v504_v18 = vmax.f32 %v381_v9, %v391_v16 }
 0x105   : > { %v512_v19 = vmax.f32 %v461_v10, %v471_v17  ;;  %v531_v20 = vmax.f32 %v505_v14, %v805_v55 }
 0x106   : > { %v539_v21 = vmax.f32 %v513_v15, %v829_v56  ;;  %v530_v22 = vmax.f32 %v504_v18, %v371_v59  ;;  %v814_v24 = vpop.f32.mrb[12].mxu0 }
 0x107   : > { %v538_v23 = vmax.f32 %v512_v19, %v451_v60  ;;  %v838_v25 = vpop.f32.mrb[12].mxu1  ;;  %v559_v26 = vld [vmem:[#allocation2 + $0x18] ss:$2 sm:$0xff]  ;;  %v575_v27 = vld [vmem:[#allocation2 + $0x19] ss:$2 sm:$0xff]  ;;  %546 = vst.msk [vmem:[#allocation2 + $0x39] sm:$0xff] %vm525_vm2, %v531_v20 }
 0x108   : > { %554 = vst.msk [vmem:[#allocation2 + $0x99] sm:$0xff] %vm525_vm2, %v539_v21  ;;  %v589_v28 = vmax.f32 %v559_v26, %v575_v27  ;;  %v567_v29 = vld [vmem:[#allocation2 + $0x78] ss:$2 sm:$0xff]  ;;  %v583_v30 = vld [vmem:[#allocation2 + $0x79] ss:$2 sm:$0xff]  ;;  %545 = vst.msk [vmem:[#allocation2 + $0x31] sm:$0xff] %vm525_vm2, %v530_v22 }
 0x109   : > { %553 = vst.msk [vmem:[#allocation2 + $0x91] sm:$0xff] %vm525_vm2, %v538_v23  ;;  %v599_v31 = vld [vmem:[#allocation2 + $0x1a] ss:$2 sm:$0xff]  ;;  %v593_v32 = vmax.f32 %v567_v29, %v583_v30  ;;  %v401_v33 = vpop.f32.mrb[13].mxu0  ;;  %v481_v34 = vpop.f32.mrb[13].mxu1 }
 0x10a   : > { %v613_v35 = vmax.f32 %v589_v28, %v599_v31  ;;  %v607_v36 = vld [vmem:[#allocation2 + $0x7a] ss:$2 sm:$0xff]  ;;  %v817_v37 = vpop.f32.mrb[14].mxu0 }
 0x10b   : > { %v841_v38 = vpop.f32.mrb[14].mxu1  ;;  %v617_v39 = vmax.f32 %v593_v32, %v607_v36  ;;  %v507_v41 = vmax.f32 %v814_v24, %v817_v37  ;;  %v535_v43 = vmax.f32 %v509_v46, %v817_v37  ;;  %v411_v47 = vpop.f32.mrb[15].mxu0 }
 0x10c   : > { %v515_v45 = vmax.f32 %v838_v25, %v841_v38  ;;  %v491_v49 = vpop.f32.mrb[15].mxu1  ;;  %621 = vst.msk [vmem:[%s1133_s8 + $0x8] sm:$0xff] %vm525_vm2, %v613_v35  ;;  %v506_v51 = vmax.f32 %v401_v33, %v411_v47  ;;  %v534_v52 = vmax.f32 %v508_v50, %v411_v47 }
 0x10d   : > { %v514_v53 = vmax.f32 %v481_v34, %v491_v49  ;;  %625 = vst.msk [vmem:[%s1133_s8 + $0x28] sm:$0xff] %vm525_vm2, %v617_v39  ;;  %v533_v54 = vmax.f32 %v507_v41, %v811_v12  ;;  %550 = vst.msk [vmem:[#allocation2 + $0x69] sm:$0xff] %vm525_vm2, %v535_v43 }
 0x10e   : > { %v541_v55 = vmax.f32 %v515_v45, %v835_v13  ;;  %v532_v56 = vmax.f32 %v506_v51, %v391_v16  ;;  %549 = vst.msk [vmem:[#allocation2 + $0x61] sm:$0xff] %vm525_vm2, %v534_v52 }
 0x10f   : > { %v540_v40 = vmax.f32 %v514_v53, %v471_v17  ;;  %v561_v44 = vld [vmem:[#allocation2 + $0x30] ss:$2 sm:$0xff]  ;;  %v577_v46 = vld [vmem:[#allocation2 + $0x31] ss:$2 sm:$0xff]  ;;  %548 = vst.msk [vmem:[#allocation2 + $0x51] sm:$0xff] %vm525_vm2, %v533_v54 }
 0x110   : > { %556 = vst.msk [vmem:[#allocation2 + $0xb1] sm:$0xff] %vm525_vm2, %v541_v55  ;;  %v590_v42 = vmax.f32 %v561_v44, %v577_v46  ;;  %v569_v48 = vld [vmem:[#allocation2 + $0x90] ss:$2 sm:$0xff]  ;;  %v585_v50 = vld [vmem:[#allocation2 + $0x91] ss:$2 sm:$0xff]  ;;  %547 = vst.msk [vmem:[#allocation2 + $0x49] sm:$0xff] %vm525_vm2, %v532_v56 }
 0x111   : > { %555 = vst.msk [vmem:[#allocation2 + $0xa9] sm:$0xff] %vm525_vm2, %v540_v40  ;;  %v601_v57 = vld [vmem:[#allocation2 + $0x32] ss:$2 sm:$0xff]  ;;  %v594_v58 = vmax.f32 %v569_v48, %v585_v50 }
 0x112   : > { %v614_v59 = vmax.f32 %v590_v42, %v601_v57  ;;  %v609_v60 = vld [vmem:[#allocation2 + $0x92] ss:$2 sm:$0xff] }
 0x113   : > { %v618_v61 = vmax.f32 %v594_v58, %v609_v60 }
 0x114   : > { %622 = vst.msk [vmem:[%s1133_s8 + $0x10] sm:$0xff] %vm525_vm2, %v614_v59 }
 0x115   : > { %626 = vst.msk [vmem:[%s1133_s8 + $0x30] sm:$0xff] %vm525_vm2, %v618_v61  ;;  %v565_v62 = vld [vmem:[#allocation2 + $0x60] ss:$2 sm:$0xff]  ;;  %v581_v63 = vld [vmem:[#allocation2 + $0x61] ss:$2 sm:$0xff] }
 0x116   : > { %v592_v0 = vmax.f32 %v565_v62, %v581_v63  ;;  %v605_v3 = vld [vmem:[#allocation2 + $0x62] ss:$2 sm:$0xff] }
 0x117   : > { %v563_v1 = vld [vmem:[#allocation2 + $0x48] ss:$2 sm:$0xff]  ;;  %v579_v2 = vld [vmem:[#allocation2 + $0x49] ss:$2 sm:$0xff] }
 0x118   : > { %v591_v4 = vmax.f32 %v563_v1, %v579_v2  ;;  %v616_v5 = vmax.f32 %v592_v0, %v605_v3  ;;  %v571_v6 = vld [vmem:[#allocation2 + $0xa8] ss:$2 sm:$0xff]  ;;  %v587_v7 = vld [vmem:[#allocation2 + $0xa9] ss:$2 sm:$0xff] }
 0x119   : > { %v603_v8 = vld [vmem:[#allocation2 + $0x4a] ss:$2 sm:$0xff]  ;;  %v595_v9 = vmax.f32 %v571_v6, %v587_v7 }
 0x11a   : > { %v615_v10 = vmax.f32 %v591_v4, %v603_v8  ;;  %624 = vst.msk [vmem:[%s1133_s8 + $0x20] sm:$0xff] %vm525_vm2, %v616_v5  ;;  %v611_v11 = vld [vmem:[#allocation2 + $0xaa] ss:$2 sm:$0xff] }
 0x11b   : > { %v619_v12 = vmax.f32 %v595_v9, %v611_v11 }
 0x11c   : > { %623 = vst.msk [vmem:[%s1133_s8 + $0x18] sm:$0xff] %vm525_vm2, %v615_v10 }
 0x11d   : > { %627 = vst.msk [vmem:[%s1133_s8 + $0x38] sm:$0xff] %vm525_vm2, %v619_v12 }
 0x11e   : > { %909 = shalt.err (!%p906_p3)
}
 0x11f   : > { %s910_s27 = scalar_lea.hbm %s1168_s21, 1024  ;;  %s914_s30 = scalar_lea.hbm %s1221_s2, 2048 }
 0x120   : > { %p911_p4 = scmp.ne.s32.totalorder %s1168_s21, %s910_s27  ;;  %p915_p9 = scmp.lt.u32.totalorder %s1168_s21, %s1221_s2 }
 0x121   : > { %p916_p10 = scmp.lt.u32.totalorder %s914_s30, %s910_s27  ;;  %p918_p12 = scmp.lt.u32.totalorder %s910_s27, %s1168_s21 }
 0x122   : > { %p912_p7 = pnand %p911_p4, %p1017_p5 }
 0x123   : > { %p917_p11 = por %p916_p10, %p915_p9 }
 0x124   : > { %p913_p8 = pneg %p912_p7 }
 0x125   : > { %p919_p13 = por %p918_p12, %p917_p11 }
 0x127   : > { %p920_p0 = pnand %p919_p13, %p913_p8 }
 0x129   : > { %923 = shalt.err (!%p920_p0)
}
 0x12a   : > { %s962_s5 = smov 128   ;;  %s963_s6 = smov 8  }
 0x12b   : > { %854 = dma.vmem_to_hbm [thread:$0]  (%p1017_p5), %s1170_s16, 1024, %s1168_s21, %s1178_s22, %s962_s5, %s962_s5, %s963_s6  }
 0x12c PF: > { %p860_p1 = scmp.ge.s32.totalorder %s958_s12, 2  ;;  %s657_s7 = sand.u32 1, %s946_s9  }
 0x12d   : > { %s658_s8 = scalar_lea.sflag [#allocation4], %s657_s7 }
 0x12e   : > { %p857_p2 = pnand %p860_p1, %p1021_p6 }
 0x130   : > { %941 = dma.done.wait (!%p857_p2), %s658_s8, 1024  }
 0x131   : > { %943 = vsyncadd (!%p857_p2), %s658_s8, 4294966272  ;;  %p12_p3 = scmp.ge.s32.totalorder %s1004_s15, 4   ;;  %s1224_s9 = smov %s950_s10 }
 0x132   : > { %s1225_s10 = smov %s954_s11  ;;  %s1226_s11 = smov %s1015_s18 }
 0x133   : > { %s1227_s12 = smov %s1004_s15  ;;  %14 = sbr.rel (!%p12_p3) target bundleno = 3 (0x3), region = 87 }
 0x13a   :  { %663 = vsyncpa [#allocation4], 1 }
 0x13b   :  { %665 = vsyncpa [#allocation4 + $0x1], 1 }

</bundles_post_ra>
